<compile_context>
chip_gen: v7x
topology: tpu7x:2x2x1
jax: 0.10.0
libtpu: 0.0.40
codegen_flags: <defaults>
</compile_context>

<pallas_src>
import functools

import jax
import jax.numpy as jnp
from jax.experimental import pallas as pl
from jax.experimental.pallas import tpu as pltpu


def _apply_act(x, act):
    if act == "relu":
        return jnp.maximum(x, 0.0)
    if act == "sigmoid":
        return jax.nn.sigmoid(x)
    if act == "tanh":
        return jnp.tanh(x)
    return x  # activation_fun may be None in the PyTorch module


def fused_mlp_kernel(*refs, act, n_classes):
    """refs = (x_ref, w0, b0, w1, b1, ..., w_{L-1}, b_{L-1}, o_ref).

    Computes: h = act(h @ W_i + b_i) for all layers, then
    probs = softmax(last scores) over the real (un-padded) class columns.
    (The activation applied to the last scores in the PyTorch loop is
    discarded — only softmax(scores) is returned; reproduced here.)
    """
    x_ref = refs[0]
    o_ref = refs[-1]
    params = refs[1:-1]
    n_layers = len(params) // 2

    h = x_ref[...]
    scores = h
    for li in range(n_layers):
        w = params[2 * li][...]
        b = params[2 * li + 1][...]          # (1, Cp) — broadcasts over rows
        scores = jnp.dot(h, w, preferred_element_type=jnp.float32) + b
        h = _apply_act(scores, act)

    # Row softmax over the real classes only: padded lanes -> -1e30.
    col = jax.lax.broadcasted_iota(jnp.int32, scores.shape, 1)
    scores = jnp.where(col < n_classes, scores, jnp.float32(-1e30))
    m = jnp.max(scores, axis=1, keepdims=True)
    e = jnp.exp(scores - m)
    denom = jnp.sum(e, axis=1, keepdims=True)
    # Exact reciprocal: one divide per row, negligible cost, exact row sums.
    inv = jnp.float32(1.0) / denom
    o_ref[...] = (e * inv).astype(o_ref.dtype)


def _round_up(x, m):
    return ((x + m - 1) // m) * m


def pt_deep_forward(X, weights, biases, activation_fun="relu", tm=None):
    """Pallas implementation of PTDeep.forward (single fused kernel)."""
    N, D = X.shape
    n_layers = len(weights)
    C = weights[-1].shape[1]

    # Pad every feature dim to a multiple of 128 (lane-dense tiles).
    dims = [D] + [w.shape[1] for w in weights]
    pdims = [_round_up(d, 128) for d in dims]

    # Batch tile: big enough to feed the MXU, multiple of 8, capped near N.
    if tm is None:
        tm = min(512, _round_up(N, 8))
    tm = max(8, _round_up(tm, 8))
    Np = _round_up(N, tm)

    # Zero-pad inputs and parameters (float32).
    Xp = jnp.zeros((Np, pdims[0]), jnp.float32).at[:N, :D].set(
        X.astype(jnp.float32))
    args = [Xp]
    for i in range(n_layers):
        w = jnp.zeros((pdims[i], pdims[i + 1]), jnp.float32)
        w = w.at[:dims[i], :dims[i + 1]].set(weights[i].astype(jnp.float32))
        b = jnp.zeros((1, pdims[i + 1]), jnp.float32)
        b = b.at[0, :dims[i + 1]].set(biases[i].astype(jnp.float32))
        args += [w, b]

    in_specs = [pl.BlockSpec((tm, pdims[0]), lambda i: (i, 0))]   # batch tile
    for li in range(n_layers):
        # full weight / bias resident in VMEM, constant index map
        in_specs.append(
            pl.BlockSpec((pdims[li], pdims[li + 1]), lambda i: (0, 0)))
        in_specs.append(pl.BlockSpec((1, pdims[li + 1]), lambda i: (0, 0)))

    kernel = functools.partial(
        fused_mlp_kernel, act=activation_fun, n_classes=C)

    out = pl.pallas_call(
        kernel,
        out_shape=jax.ShapeDtypeStruct((Np, pdims[-1]), jnp.float32),
        grid_spec=pltpu.PrefetchScalarGridSpec(
            num_scalar_prefetch=0,
            grid=(Np // tm,),
            in_specs=in_specs,
            out_specs=pl.BlockSpec((tm, pdims[-1]), lambda i: (i, 0)),
        ),
        compiler_params=pltpu.CompilerParams(
            dimension_semantics=("parallel",)),
    )(*args)

    # Strip batch / class padding.
    return out[:N, :C]


def init_params(key, layers):
    """torch.randn weights, zero biases (deterministic via PRNGKey)."""
    weights, biases = [], []
    for i in range(len(layers) - 1):
        key, sub = jax.random.split(key)
        weights.append(
            jax.random.normal(sub, (layers[i], layers[i + 1]),
                              dtype=jnp.float32))
        biases.append(jnp.zeros((layers[i + 1],), dtype=jnp.float32))
    return weights, biases


def _ref_forward(X, weights, biases, activation_fun="relu"):
    """Pure-JAX reference of PTDeep.forward (f32)."""
    h = X
    scores = X
    for W, b in zip(weights, biases):
        scores = h @ W + b
        h = _apply_act(scores, activation_fun)
    return jax.nn.softmax(scores, axis=1)


if __name__ == "__main__":
    # small shapes: batch=16, layers [16, 32, 10], relu activation
    layers = [16, 32, 10]
    N = 16
    key = jax.random.PRNGKey(0)
    key, kx = jax.random.split(key)
    X = jax.random.normal(kx, (N, layers[0]), dtype=jnp.float32)
    weights, biases = init_params(key, layers)

    probs = pt_deep_forward(X, weights, biases, activation_fun="relu")
    probs = jax.block_until_ready(probs)

    assert probs.shape == (N, layers[-1])

    # rows of a softmax must sum to 1 (exact reciprocal -> fp32 precision)
    row_sums = jnp.sum(probs, axis=1)
    assert bool(jnp.allclose(row_sums, jnp.ones_like(row_sums), atol=1e-5))

    # match the pure-JAX reference
    ref = _ref_forward(X, weights, biases, activation_fun="relu")
    assert bool(jnp.allclose(probs, ref, atol=1e-5, rtol=1e-5))

    print("KERNEL_OK")
</pallas_src>

<mosaic_0001>
module attributes {stable_mosaic.version = 11 : i64} {
  func.func @fused_mlp_kernel(%arg0: i32, %arg1: memref<16x128xf32, #tpu.memory_space<vmem>>, %arg2: memref<128x128xf32, #tpu.memory_space<vmem>>, %arg3: memref<1x128xf32, #tpu.memory_space<vmem>>, %arg4: memref<128x128xf32, #tpu.memory_space<vmem>>, %arg5: memref<1x128xf32, #tpu.memory_space<vmem>>, %arg6: memref<16x128xf32, #tpu.memory_space<vmem>>) attributes {dimension_semantics = [#tpu.dimension_semantics<parallel>], iteration_bounds = array<i64: 1>, scalar_prefetch = 0 : i64, scratch_operands = 0 : i64, tpu.core_type = #tpu.core_type<tc>, window_params = [{transform_indices = @transform_0, window_bounds = array<i64: 16, 128>}, {pipeline_mode = #tpu.pipeline_mode<synchronous>, transform_indices = @transform_1, window_bounds = array<i64: 128, 128>}, {pipeline_mode = #tpu.pipeline_mode<synchronous>, transform_indices = @transform_2, window_bounds = array<i64: 1, 128>}, {pipeline_mode = #tpu.pipeline_mode<synchronous>, transform_indices = @transform_3, window_bounds = array<i64: 128, 128>}, {pipeline_mode = #tpu.pipeline_mode<synchronous>, transform_indices = @transform_4, window_bounds = array<i64: 1, 128>}, {transform_indices = @transform_5, window_bounds = array<i64: 16, 128>}]} {
    %c0 = arith.constant 0 : index
    %c0_0 = arith.constant 0 : index
    %0 = vector.load %arg1[%c0, %c0_0] : memref<16x128xf32, #tpu.memory_space<vmem>>, vector<16x128xf32>
    %c0_1 = arith.constant 0 : index
    %c0_2 = arith.constant 0 : index
    %1 = vector.load %arg2[%c0_1, %c0_2] : memref<128x128xf32, #tpu.memory_space<vmem>>, vector<128x128xf32>
    %c0_3 = arith.constant 0 : index
    %c0_4 = arith.constant 0 : index
    %2 = vector.load %arg3[%c0_3, %c0_4] : memref<1x128xf32, #tpu.memory_space<vmem>>, vector<1x128xf32>
    %cst = arith.constant dense<0.000000e+00> : vector<16x128xf32>
    %3 = tpu.matmul %0, %1, %cst {dimension_numbers = #tpu.dot_dimension_numbers<[1], [0], [0], [1], [0, 0, 1, 1], [], []>} : vector<16x128xf32>, vector<128x128xf32>, vector<16x128xf32> -> vector<16x128xf32>
    %4 = vector.broadcast %2 : vector<1x128xf32> to vector<16x128xf32>
    %5 = arith.addf %3, %4 : vector<16x128xf32>
    %cst_5 = arith.constant 0.000000e+00 : f32
    %6 = vector.broadcast %cst_5 : f32 to vector<16x128xf32>
    %7 = arith.maximumf %5, %6 : vector<16x128xf32>
    %c0_6 = arith.constant 0 : index
    %c0_7 = arith.constant 0 : index
    %8 = vector.load %arg4[%c0_6, %c0_7] : memref<128x128xf32, #tpu.memory_space<vmem>>, vector<128x128xf32>
    %c0_8 = arith.constant 0 : index
    %c0_9 = arith.constant 0 : index
    %9 = vector.load %arg5[%c0_8, %c0_9] : memref<1x128xf32, #tpu.memory_space<vmem>>, vector<1x128xf32>
    %cst_10 = arith.constant dense<0.000000e+00> : vector<16x128xf32>
    %10 = tpu.matmul %7, %8, %cst_10 {dimension_numbers = #tpu.dot_dimension_numbers<[1], [0], [0], [1], [0, 0, 1, 1], [], []>} : vector<16x128xf32>, vector<128x128xf32>, vector<16x128xf32> -> vector<16x128xf32>
    %11 = vector.broadcast %9 : vector<1x128xf32> to vector<16x128xf32>
    %12 = arith.addf %10, %11 : vector<16x128xf32>
    %13 = tpu.iota {dimensions = array<i32: 1>} : vector<16x128xi32>
    %c10_i32 = arith.constant 10 : i32
    %14 = vector.broadcast %c10_i32 : i32 to vector<16x128xi32>
    %15 = arith.cmpi slt, %13, %14 : vector<16x128xi32>
    %cst_11 = arith.constant -1.000000e+30 : f32
    %16 = vector.broadcast %cst_11 : f32 to vector<16x128xf32>
    %17 = arith.select %15, %12, %16 : vector<16x128xi1>, vector<16x128xf32>
    %cst_12 = arith.constant dense<0xFF800000> : vector<16xf32>
    %18 = vector.multi_reduction <maximumf>, %17, %cst_12 [1] : vector<16x128xf32> to vector<16xf32>
    %19 = vector.shape_cast %18 : vector<16xf32> to vector<16x1xf32>
    %20 = vector.broadcast %19 : vector<16x1xf32> to vector<16x128xf32>
    %21 = arith.subf %17, %20 : vector<16x128xf32>
    %22 = math.exp %21 : vector<16x128xf32>
    %cst_13 = arith.constant dense<0.000000e+00> : vector<16xf32>
    %23 = vector.multi_reduction <add>, %22, %cst_13 [1] : vector<16x128xf32> to vector<16xf32>
    %24 = vector.shape_cast %23 : vector<16xf32> to vector<16x1xf32>
    %cst_14 = arith.constant 1.000000e+00 : f32
    %25 = vector.broadcast %cst_14 : f32 to vector<16x1xf32>
    %26 = arith.divf %25, %24 : vector<16x1xf32>
    %27 = vector.broadcast %26 : vector<16x1xf32> to vector<16x128xf32>
    %28 = arith.mulf %22, %27 : vector<16x128xf32>
    %c0_15 = arith.constant 0 : index
    %c0_16 = arith.constant 0 : index
    %29 = vector.load %arg6[%c0_15, %c0_16] : memref<16x128xf32, #tpu.memory_space<vmem>>, vector<16x128xf32>
    tpu.vector_store %arg6[%c0_15, %c0_16], %28 {strides = array<i32>} : memref<16x128xf32, #tpu.memory_space<vmem>>, vector<16x128xf32>,
    return
  }
  func.func @transform_0(%arg0: i32) -> (i32, i32) {
    %c0_i32 = arith.constant 0 : i32
    %c0_i32_0 = arith.constant 0 : i32
    return %arg0, %c0_i32 : i32, i32
  }
  func.func @transform_1(%arg0: i32) -> (i32, i32) {
    %c0_i32 = arith.constant 0 : i32
    %c0_i32_0 = arith.constant 0 : i32
    %c0_i32_1 = arith.constant 0 : i32
    return %c0_i32, %c0_i32_0 : i32, i32
  }
  func.func @transform_2(%arg0: i32) -> (i32, i32) {
    %c0_i32 = arith.constant 0 : i32
    %c0_i32_0 = arith.constant 0 : i32
    %c0_i32_1 = arith.constant 0 : i32
    return %c0_i32, %c0_i32_0 : i32, i32
  }
  func.func @transform_3(%arg0: i32) -> (i32, i32) {
    %c0_i32 = arith.constant 0 : i32
    %c0_i32_0 = arith.constant 0 : i32
    %c0_i32_1 = arith.constant 0 : i32
    return %c0_i32, %c0_i32_0 : i32, i32
  }
  func.func @transform_4(%arg0: i32) -> (i32, i32) {
    %c0_i32 = arith.constant 0 : i32
    %c0_i32_0 = arith.constant 0 : i32
    %c0_i32_1 = arith.constant 0 : i32
    return %c0_i32, %c0_i32_0 : i32, i32
  }
  func.func @transform_5(%arg0: i32) -> (i32, i32) {
    %c0_i32 = arith.constant 0 : i32
    %c0_i32_0 = arith.constant 0 : i32
    return %arg0, %c0_i32 : i32, i32
  }
}

</mosaic_0001>

<bundles_post_ra>
// kernel: tpu_custom_call.1
= control target key start
LH: loop header
LB: loop body
LE: loop exit
PB: predicated region body
PF: predicated region fallthrough
CT: control target
= control target key end

     0   :  { %10 = vsyncpa [#allocation3], 0  ;;  %s696_s0 = inlined_call_operand.hbm [shape: f32[16,128], index: 0, kind: input, shape index: {}]   ;;  %s697_s1 = inlined_call_operand.hbm [shape: f32[128,128], index: 1, kind: input, shape index: {}]   ;;  %s698_s2 = inlined_call_operand.vmem [shape: f32[1,128], index: 2, kind: input, shape index: {}]   ;;  %s699_s3 = inlined_call_operand.hbm [shape: f32[128,128], index: 3, kind: input, shape index: {}]   ;;  %s700_s4 = inlined_call_operand.vmem [shape: f32[1,128], index: 4, kind: input, shape index: {}]   ;;  %s701_s5 = inlined_call_operand.hbm [shape: f32[16,128], index: 5, kind: output, shape index: {}]  }
   0x1   :  { %11 = vsyncpa [#allocation6], 0 }
   0x2   :  { %12 = vsyncpa [#allocation4], 0  ;;  %s587_s18 = smov [#allocation5]   ;;  %s588_s20 = smov [#allocation2]  }
   0x3   :  { %s30_s19 = sshll.u32 %s587_s18, 4  ;;  %s18_s21 = sshll.u32 %s588_s20, 4  ;;  %s31_s19 = int_to_ptr.vmem [resolvable:$true] %s30_s19  ;;  %s623_s21 = int_to_ptr.vmem [resolvable:$true] %s18_s21 }
   0x4   :  { %s493_s24 = scalar_lea.hbm %s697_s1, 2048 }
   0x5   :  { %p494_p0 = scmp.ne.s32.totalorder %s697_s1, %s493_s24  ;;  %p497_p1 = scmp.lt.u32.totalorder %s493_s24, %s697_s1 }
   0x7   :  { %p499_p2 = pnand %p497_p1, %p494_p0 }
   0x9   :  { %502 = shalt.err (!%p499_p2)
}
   0xa   :  { %s503_s29 = scalar_lea.vmem %s31_s19, 2048  ;;  %p508_p4 = scmp.lt.s32.totalorder %s31_s19, %s31_s19 }
   0xb   :  { %p504_p3 = scmp.ne.s32.totalorder %s31_s19, %s503_s29  ;;  %p509_p5 = scmp.lt.s32.totalorder %s503_s29, %s503_s29 }
   0xd   :  { %p510_p6 = por %p509_p5, %p508_p4 }
   0xf   :  { %p511_p7 = pnand %p510_p6, %p504_p3 }
  0x11   :  { %514 = shalt.err (!%p511_p7)
}
  0x12   :  { %s589_s30 = smov 128   ;;  %s590_s6 = smov 8  }
  0x13   :  { %36 = dma.hbm_to_vmem [thread:$0]  %s697_s1, 2048, %s31_s19, [#allocation6], %s589_s30, %s589_s30, %s590_s6  }
  0x14   :  { %s515_s11 = scalar_lea.hbm %s696_s0, 256 }
  0x15   :  { %p516_p8 = scmp.ne.s32.totalorder %s696_s0, %s515_s11  ;;  %p519_p9 = scmp.lt.u32.totalorder %s515_s11, %s696_s0 }
  0x17   :  { %p521_p10 = pnand %p519_p9, %p516_p8 }
  0x19   :  { %524 = shalt.err (!%p521_p10)
}
  0x1a   :  { %s525_s16 = scalar_lea.vmem %s623_s21, 256  ;;  %p530_p12 = scmp.lt.s32.totalorder %s623_s21, %s623_s21 }
  0x1b   :  { %p526_p11 = scmp.ne.s32.totalorder %s623_s21, %s525_s16  ;;  %p531_p13 = scmp.lt.s32.totalorder %s525_s16, %s525_s16 }
  0x1d   :  { %p532_p0 = por %p531_p13, %p530_p12 }
  0x1f   :  { %p533_p1 = pnand %p532_p0, %p526_p11 }
  0x21   :  { %536 = shalt.err (!%p533_p1)
}
  0x22   :  { %24 = dma.hbm_to_vmem [thread:$0]  %s696_s0, 256, %s623_s21, [#allocation3], %s589_s30, %s589_s30, %s590_s6  }
  0x23   :  { %s591_s18 = smov [#allocation7]   ;;  %s537_s23 = scalar_lea.hbm %s699_s3, 2048 }
  0x24   :  { %s44_s19 = sshll.u32 %s591_s18, 4  ;;  %p538_p2 = scmp.ne.s32.totalorder %s699_s3, %s537_s23  ;;  %s45_s19 = int_to_ptr.vmem [resolvable:$true] %s44_s19 }
  0x25   :  { %p541_p3 = scmp.lt.u32.totalorder %s537_s23, %s699_s3 }
  0x27   :  { %p543_p4 = pnand %p541_p3, %p538_p2 }
  0x29   :  { %546 = shalt.err (!%p543_p4)
}
  0x2a   :  { %s547_s28 = scalar_lea.vmem %s45_s19, 2048  ;;  %p552_p6 = scmp.lt.s32.totalorder %s45_s19, %s45_s19 }
  0x2b   :  { %p548_p5 = scmp.ne.s32.totalorder %s45_s19, %s547_s28  ;;  %p553_p7 = scmp.lt.s32.totalorder %s547_s28, %s547_s28 }
  0x2d   :  { %p554_p8 = por %p553_p7, %p552_p6 }
  0x2f   :  { %p555_p9 = pnand %p554_p8, %p548_p5 }
  0x31   :  { %558 = shalt.err (!%p555_p9)
}
  0x32   :  { %50 = dma.hbm_to_vmem [thread:$0]  %s699_s3, 2048, %s45_s19, [#allocation6], %s589_s30, %s589_s30, %s590_s6  }
  0x33   :  { %581 = dma.done.wait [#allocation3], 256  }
  0x34   :  { %582 = vsyncadd [#allocation3], 4294967040 }
  0x35   :  { %583 = dma.done.wait [#allocation6], 4096  }
  0x36   :  { %584 = vsyncadd [#allocation6], 4294963200  ;;  %v64_v0 = vld [vmem:[#allocation5] sm:$0xff]  ;;  %v65_v1 = vld [vmem:[#allocation5 + $0x8] sm:$0xff]  ;;  %v262_v57 = vlaneseq }
  0x37   :  { %v66_v2 = vld [vmem:[#allocation5 + $0x10] sm:$0xff]  ;;  %v415_v3 = vpack.c.bf16 %v65_v1, %v64_v0  ;;  %v67_v4 = vld [vmem:[#allocation5 + $0x18] sm:$0xff]  ;;  %v68_v6 = vld [vmem:[#allocation5 + $0x20] sm:$0xff] }
  0x38   :  { %v419_v5 = vpack.c.bf16 %v67_v4, %v66_v2  ;;  %v69_v7 = vld [vmem:[#allocation5 + $0x28] sm:$0xff]  ;;  %v70_v9 = vld [vmem:[#allocation5 + $0x30] sm:$0xff]  ;;  %v71_v10 = vld [vmem:[#allocation5 + $0x38] sm:$0xff]  ;;  %v263_v58 = vand.u32 127, %v262_v57 }
  0x39   :  { %416 = vmatprep.subr.bf16.mxu0 %v415_v3  ;;  %v423_v8 = vpack.c.bf16 %v69_v7, %v68_v6  ;;  %v62_v11 = vld [vmem:[#allocation2] sm:$0xff]  ;;  %v164_v12 = vld [vmem:[#allocation7] sm:$0xff]  ;;  %v165_v13 = vld [vmem:[#allocation7 + $0x8] sm:$0xff]  ;;  %v427_v20 = vpack.c.bf16 %v71_v10, %v70_v9 }
  0x3a   :  { %418 = vmatpush3.bf16.msra.mxu0 %v415_v3  ;;  %377 = vmatprep.mubr.f32.mxu0 %v62_v11  ;;  %v166_v14 = vld [vmem:[#allocation7 + $0x10] sm:$0xff]  ;;  %v447_v15 = vpack.c.bf16 %v165_v13, %v164_v12  ;;  %v167_v16 = vld [vmem:[#allocation7 + $0x18] sm:$0xff]  ;;  %v168_v18 = vld [vmem:[#allocation7 + $0x20] sm:$0xff]  ;;  %vm264_vm0 = vcmp.lt.s32.totalorder %v263_v58, 10 }
  0x3b   :  { %420 = vmatprep.subr.bf16.mxu0 %v419_v5  ;;  %v451_v17 = vpack.c.bf16 %v167_v16, %v166_v14  ;;  %v169_v19 = vld [vmem:[#allocation7 + $0x28] sm:$0xff]  ;;  %v72_v21 = vld [vmem:[#allocation5 + $0x40] sm:$0xff]  ;;  %v170_v24 = vld [vmem:[#allocation7 + $0x30] sm:$0xff] }
  0x3c   :  { %448 = vmatprep.subr.bf16.mxu1 %v447_v15  ;;  %v73_v22 = vld [vmem:[#allocation5 + $0x48] sm:$0xff]  ;;  %v455_v23 = vpack.c.bf16 %v169_v19, %v168_v18  ;;  %v171_v25 = vld [vmem:[#allocation7 + $0x38] sm:$0xff]  ;;  %v74_v27 = vld [vmem:[#allocation5 + $0x50] sm:$0xff] }
  0x3d   :  { %450 = vmatpush3.bf16.msra.mxu1 %v447_v15  ;;  %v431_v26 = vpack.c.bf16 %v73_v22, %v72_v21  ;;  %v75_v28 = vld [vmem:[#allocation5 + $0x58] sm:$0xff]  ;;  %v459_v29 = vpack.c.bf16 %v171_v25, %v170_v24  ;;  %v172_v30 = vld [vmem:[#allocation7 + $0x40] sm:$0xff]  ;;  %v173_v31 = vld [vmem:[#allocation7 + $0x48] sm:$0xff] }
  0x3e   :  { %422 = vmatpush3.bf16.msra.mxu0 %v419_v5  ;;  %452 = vmatprep.subr.bf16.mxu1 %v451_v17  ;;  %v435_v32 = vpack.c.bf16 %v75_v28, %v74_v27  ;;  %v76_v33 = vld [vmem:[#allocation5 + $0x60] sm:$0xff]  ;;  %v77_v34 = vld [vmem:[#allocation5 + $0x68] sm:$0xff]  ;;  %v463_v35 = vpack.c.bf16 %v173_v31, %v172_v30  ;;  %v174_v36 = vld [vmem:[#allocation7 + $0x50] sm:$0xff] }
  0x3f   :  { %424 = vmatprep.subr.bf16.mxu0 %v423_v8  ;;  %v175_v37 = vld [vmem:[#allocation7 + $0x58] sm:$0xff]  ;;  %v439_v38 = vpack.c.bf16 %v77_v34, %v76_v33  ;;  %v78_v39 = vld [vmem:[#allocation5 + $0x70] sm:$0xff]  ;;  %v176_v42 = vld [vmem:[#allocation7 + $0x60] sm:$0xff] }
  0x40   :  { %v79_v40 = vld [vmem:[#allocation5 + $0x78] sm:$0xff]  ;;  %v467_v41 = vpack.c.bf16 %v175_v37, %v174_v36  ;;  %v177_v43 = vld [vmem:[#allocation7 + $0x68] sm:$0xff]  ;;  %v178_v47 = vld [vmem:[#allocation7 + $0x70] sm:$0xff] }
  0x41   :  { %454 = vmatpush3.bf16.msra.mxu1 %v451_v17  ;;  %v443_v44 = vpack.c.bf16 %v79_v40, %v78_v39  ;;  %v471_v45 = vpack.c.bf16 %v177_v43, %v176_v42  ;;  %v63_v46 = vld [vmem:[#allocation2 + $0x8] sm:$0xff]  ;;  %v307_v50 = vld [vmem:[%s698_s2] ss:$0 sm:$0xff]  ;;  %s592_s2 = smov [#allocation8]  }
  0x42   :  { %426 = vmatpush3.bf16.msra.mxu0 %v423_v8  ;;  %456 = vmatprep.subr.bf16.mxu1 %v455_v23  ;;  %v179_v48 = vld [vmem:[#allocation7 + $0x78] sm:$0xff]  ;;  %v308_v59 = vld [vmem:[%s700_s4] ss:$0 sm:$0xff]  ;;  %s294_s4 = sshll.u32 %s592_s2, 4  ;;  %s295_s4 = int_to_ptr.vmem [resolvable:$true] %s294_s4 }
  0x43   :  { %428 = vmatprep.subr.bf16.mxu0 %v427_v20  ;;  %v475_v49 = vpack.c.bf16 %v179_v48, %v178_v47  ;;  %s559_s9 = scalar_lea.vmem %s295_s4, 256  ;;  %p564_p11 = scmp.lt.s32.totalorder %s295_s4, %s295_s4 }
  0x44   :  { %p560_p10 = scmp.ne.s32.totalorder %s295_s4, %s559_s9  ;;  %p565_p12 = scmp.lt.s32.totalorder %s559_s9, %s559_s9 }
  0x45   :  { %458 = vmatpush3.bf16.msra.mxu1 %v455_v23 }
  0x46   :  { %430 = vmatpush3.bf16.msra.mxu0 %v427_v20  ;;  %460 = vmatprep.subr.bf16.mxu1 %v459_v29  ;;  %p566_p13 = por %p565_p12, %p564_p11 }
  0x47   :  { %432 = vmatprep.subr.bf16.mxu0 %v431_v26 }
  0x48   :  { %p567_p0 = pnand %p566_p13, %p560_p10 }
  0x49   :  { %462 = vmatpush3.bf16.msra.mxu1 %v459_v29 }
  0x4a   :  { %434 = vmatpush3.bf16.msra.mxu0 %v431_v26  ;;  %464 = vmatprep.subr.bf16.mxu1 %v463_v35 }
  0x4b   :  { %436 = vmatprep.subr.bf16.mxu0 %v435_v32 }
  0x4d   :  { %466 = vmatpush3.bf16.msra.mxu1 %v463_v35 }
  0x4e   :  { %438 = vmatpush3.bf16.msra.mxu0 %v435_v32  ;;  %468 = vmatprep.subr.bf16.mxu1 %v467_v41 }
  0x4f   :  { %440 = vmatprep.subr.bf16.mxu0 %v439_v38 }
  0x51   :  { %470 = vmatpush3.bf16.msra.mxu1 %v467_v41 }
  0x52   :  { %442 = vmatpush3.bf16.msra.mxu0 %v439_v38  ;;  %472 = vmatprep.subr.bf16.mxu1 %v471_v45 }
  0x53   :  { %444 = vmatprep.subr.bf16.mxu0 %v443_v44 }
  0x55   :  { %474 = vmatpush3.bf16.msra.mxu1 %v471_v45 }
  0x56   :  { %446 = vmatpush3.bf16.msra.mxu0 %v443_v44  ;;  %476 = vmatprep.subr.bf16.mxu1 %v475_v49 }
  0x59   :  { %378 = vmatmul.mubr.f32.vlgmr.msra.gmra.mrb[0].mxu0 %v63_v46  ;;  %478 = vmatpush3.bf16.msra.mxu1 %v475_v49 }
 0x12c   :  { %v379_v51 = vpop.f32.mrb[0].mxu0 }
 0x12d   :  { %v159_v52 = vadd.f32 %v379_v51, %v307_v50  ;;  %v153_v53 = vpop.f32.mrb[1].mxu0 }
 0x12e   :  { %v154_v54 = vadd.f32 %v307_v50, %v153_v53 }
 0x12f   :  { %v163_v56 = vmax.f32 %v159_v52, 0.0 }
 0x130   :  { %v162_v55 = vmax.f32 %v154_v54, 0.0 }
 0x132   :  { %412 = vmatprep.mubr.f32.mxu1 %v162_v55 }
 0x133   :  { %413 = vmatmul.mubr.f32.vlgmr.msra.gmra.mrb[0].mxu1 %v163_v56 }
 0x206   :  { %v414_v60 = vpop.f32.mrb[0].mxu1 }
 0x207   :  { %v253_v61 = vpop.f32.mrb[1].mxu1  ;;  %v259_v63 = vadd.f32 %v414_v60, %v308_v59 }
 0x208   :  { %v254_v62 = vadd.f32 %v308_v59, %v253_v61 }
 0x209   :  { %v266_v1 = vsel %vm264_vm0, %v259_v63, -1e+30 }
 0x20a   :  { %v265_v0 = vsel %vm264_vm0, %v254_v62, -1e+30 }
 0x20b   :  { %267 = vmax.xlane.f32.xlu0 %v265_v0 }
 0x20f   :  { %269 = vmax.xlane.f32.xlu0 %v266_v1 }
 0x298   :  { %v268_v2 = vpop.xlane.xlu0 %267 }
 0x299   :  { %v271_v3 = vsub.f32 %v265_v0, %v268_v2 }
 0x29b   :  { %v273_v4 = vmul.f32 1.442695, %v271_v3 }
 0x29c   :  { %v270_v5 = vpop.xlane.xlu0 %269 }
 0x29d   :  { %485 = vpow2.f32 %v273_v4  ;;  %v272_v6 = vsub.f32 %v266_v1, %v270_v5 }
 0x29f   :  { %v275_v7 = vmul.f32 1.442695, %v272_v6 }
 0x2a1   :  { %487 = vpow2.f32 %v275_v7 }
 0x2a7   :  { %v486_v8 = vpop.eup %485 }
 0x2a8   :  { %277 = vadd.xlane.f32.xlu1 %v486_v8 }
 0x2ab   :  { %v488_v9 = vpop.eup %487 }
 0x2ac   :  { %279 = vadd.xlane.f32.xlu1 %v488_v9 }
 0x335   :  { %v278_v10 = vpop.xlane.xlu1 %277 }
 0x336   :  { %489 = vrcp.f32 %v278_v10 }
 0x339   :  { %v280_v11 = vpop.xlane.xlu1 %279 }
 0x33a   :  { %491 = vrcp.f32 %v280_v11 }
 0x340   :  { %v490_v12 = vpop.eup %489 }
 0x341   :  { %v285_v13 = vmul.f32 %v490_v12, %v486_v8 }
 0x343   :  { %287 = vst [vmem:[#allocation8] sm:$0xff] %v285_v13 }
 0x344   :  { %v492_v14 = vpop.eup %491 }
 0x345   :  { %v286_v15 = vmul.f32 %v492_v14, %v488_v9 }
 0x347   :  { %288 = vst [vmem:[#allocation8 + $0x8] sm:$0xff] %v286_v15 }
 0x348   :  { %570 = shalt.err (!%p567_p0)
}
 0x349   :  { %s571_s12 = scalar_lea.hbm %s701_s5, 256 }
 0x34a   :  { %p572_p1 = scmp.ne.s32.totalorder %s701_s5, %s571_s12  ;;  %p575_p2 = scmp.lt.u32.totalorder %s571_s12, %s701_s5 }
 0x34c   :  { %p577_p3 = pnand %p575_p2, %p572_p1 }
 0x34e   :  { %580 = shalt.err (!%p577_p3)
}
 0x34f   :  { %300 = dma.vmem_to_hbm [thread:$0]  %s295_s4, 256, %s701_s5, [#allocation4], %s589_s30, %s589_s30, %s590_s6  }
 0x350   :  { %585 = dma.done.wait [#allocation4], 256  }
 0x351   :  { %586 = vsyncadd [#allocation4], 4294967040 }
 0x352   :  { %304 = vsyncpa [#allocation3], 1 }
 0x353   :  { %305 = vsyncpa [#allocation6], 1 }
 0x354   :  { %306 = vsyncpa [#allocation4], 1 }

</bundles_post_ra>
